<compile_context>
chip_gen: v6e
topology: v6e:2x2x1
jax: 0.10.0
libtpu: 0.0.40
codegen_flags: <defaults>
</compile_context>

<pallas_src>
import jax
import jax.numpy as jnp
import numpy as np
from jax.experimental import pallas as pl
from jax.experimental.pallas import tpu as pltpu


def _topo_mse_kernel(tconst_ref, pred_ref, w_ref, ref_ref, out_ref,
                     sum_sc, pmax_sc, pmin_sc):
    """Blocks: pred/w/ref are (rows, hw_chunk); tconst is (rows, 1);
    out is (rows, 128); scratch accumulators are (rows, 1) f32."""
    s = pl.program_id(1)

    @pl.when(s == 0)
    def _init():
        sum_sc[...] = jnp.zeros(sum_sc.shape, jnp.float32)
        pmax_sc[...] = jnp.full(pmax_sc.shape, -jnp.inf, jnp.float32)
        pmin_sc[...] = jnp.full(pmin_sc.shape, jnp.inf, jnp.float32)

    p = pred_ref[...].astype(jnp.float32)
    w = w_ref[...].astype(jnp.float32)   # binary {0,1} mask -> exact cast
    r = ref_ref[...].astype(jnp.float32)

    d = p * w - r
    sum_sc[...] = sum_sc[...] + jnp.sum(d * d, axis=-1, keepdims=True)
    pmax_sc[...] = jnp.maximum(pmax_sc[...],
                               jnp.max(p, axis=-1, keepdims=True))
    pmin_sc[...] = jnp.minimum(pmin_sc[...],
                               jnp.min(p, axis=-1, keepdims=True))

    @pl.when(s == pl.num_programs(1) - 1)
    def _finalize():
        # getTopoLoss2d returns 0.0 when the min-max-normalized image is
        # degenerate, i.e. when the pred or target channel is constant.
        p_const = pmax_sc[...] == pmin_sc[...]          # (rows, 1)
        t_const = tconst_ref[...] > 0.5                 # (rows, 1)
        per_row = jnp.where(jnp.logical_or(p_const, t_const),
                            0.0, sum_sc[...])           # (rows, 1)
        out_ref[...] = jnp.broadcast_to(per_row, out_ref.shape)


def _choose_tiles(R, HW, stream_bytes_per_elem, *, hw_chunk=None,
                  max_step_stream_bytes=8 << 20, min_split_bytes=512 << 10):
    """Pick (rows_per_block, hw_chunk).

    Tiling rules: each block dim must be a multiple of the (8, 128) register
    tile or span the full array dim.  Budget: per-buffer sum of the three
    input streams <= max_step_stream_bytes, so with double-buffering the
    footprint stays comfortably inside every generation's scoped-VMEM limit
    (v7x has only 64 MiB physical per TensorCore).
    """
    row_cands = sorted({d for d in range(8, R + 1, 8) if R % d == 0} | {R})
    if hw_chunk is not None:
        hw_cands = [hw_chunk]
    else:
        hw_cands = sorted({d for d in range(128, HW + 1, 128) if HW % d == 0}
                          | {HW})

    budget = max_step_stream_bytes
    rows_min = row_cands[0]
    # Widest (lane-dense) spatial chunk that fits with the smallest row block.
    hw = hw_cands[0]
    for c in hw_cands:
        if rows_min * c * stream_bytes_per_elem <= budget:
            hw = c
    # Fattest row block that fits with that chunk.
    rows = row_cands[0]
    for rc in row_cands:
        if rc * hw * stream_bytes_per_elem <= budget:
            rows = rc
    # v7x megacore: prefer an even (>=2) number of "parallel" row groups as
    # long as blocks stay fat; odd/1 step counts leave one TC idle.
    if R // rows < 2:
        for rc in sorted(row_cands, reverse=True):
            n = R // rc
            if (n >= 2 and n % 2 == 0
                    and rc * hw * stream_bytes_per_elem >= min_split_bytes):
                rows = rc
                break
    return rows, hw


def topo_mse_2d(pred, target, weight_map, ref_map, *,
                target_const=None, hw_chunk=None):
    """Per-batch topo loss, shape (B,), float32.  Inputs are NCHW."""
    B, C, H, W = pred.shape
    R, HW = B * C, H * W

    # Degenerate-target mask.  In the real module the CPU PH pass already
    # scans target (interpolate() computes its min/max), so this (B, C) mask
    # is available for free; here we accept it precomputed or derive it with
    # a trivially cheap XLA reduce.  The dense target image itself is NOT
    # streamed into the kernel.
    if target_const is None:
        target_const = (jnp.max(target, axis=(2, 3))
                        == jnp.min(target, axis=(2, 3)))
    t_const = target_const.reshape(R, 1).astype(jnp.float32)

    # Sublane/lane-dense layout: (B*C, H*W).  For W < 128 the NCHW HBM layout
    # is heavily lane-padded, so this relayout copy pays for itself; when
    # W % 128 == 0 a 4-D (rows, tH, W) blocking of the original layout would
    # avoid the copy (not needed at these shapes).
    pred2 = pred.reshape(R, HW)
    w2 = weight_map.reshape(R, HW)   # binary {0,1} -> int8 stays exact; keep
                                     # the caller's dtype if the map is not
                                     # binary (real PH weights are {0,1}).
    r2 = ref_map.reshape(R, HW).astype(jnp.float32)

    stream_bpe = (pred2.dtype.itemsize + w2.dtype.itemsize
                  + r2.dtype.itemsize)
    rows, hw = _choose_tiles(R, HW, stream_bpe, hw_chunk=hw_chunk)
    n_groups, n_spatial = R // rows, HW // hw

    img_spec = pl.BlockSpec((rows, hw), lambda g, s: (g, s))
    tconst_spec = pl.BlockSpec((rows, 1), lambda g, s: (g, 0))
    out_spec = pl.BlockSpec((rows, 128), lambda g, s: (g, 0))

    bytes_accessed = (pred2.size * pred2.dtype.itemsize
                      + w2.size * w2.dtype.itemsize
                      + r2.size * r2.dtype.itemsize
                      + t_const.size * 4 + R * 128 * 4)
    cost = pl.CostEstimate(flops=8 * R * HW, transcendentals=0,
                           bytes_accessed=int(bytes_accessed))

    out_rows = pl.pallas_call(
        _topo_mse_kernel,
        out_shape=jax.ShapeDtypeStruct((R, 128), jnp.float32),
        grid_spec=pltpu.PrefetchScalarGridSpec(
            num_scalar_prefetch=0,
            grid=(n_groups, n_spatial),
            in_specs=[tconst_spec, img_spec, img_spec, img_spec],
            out_specs=out_spec,
            scratch_shapes=[pltpu.VMEM((rows, 1), jnp.float32),
                            pltpu.VMEM((rows, 1), jnp.float32),
                            pltpu.VMEM((rows, 1), jnp.float32)],
        ),
        compiler_params=pltpu.CompilerParams(
            dimension_semantics=("parallel", "arbitrary"),
            vmem_limit_bytes=48 << 20),
        cost_estimate=cost,
    )(t_const, pred2, w2, r2)

    # Per-row (b, c) loss is broadcast across the lane-dense output slab;
    # the channel average over C elements is negligible trailing XLA work.
    per_channel = out_rows[:, 0].reshape(B, C)
    return jnp.mean(per_channel, axis=1)


def topo_mse_reference(pred, target, w, r):
    """Pure-JAX reference of the same hot path (for verification)."""
    p = pred.astype(jnp.float32)
    w = w.astype(jnp.float32)
    r = r.astype(jnp.float32)
    per = jnp.sum((p * w - r) ** 2, axis=(2, 3))
    pred_const = jnp.max(p, axis=(2, 3)) == jnp.min(p, axis=(2, 3))
    tgt_const = jnp.max(target, axis=(2, 3)) == jnp.min(target, axis=(2, 3))
    per = jnp.where(jnp.logical_or(pred_const, tgt_const), 0.0, per)
    return jnp.mean(per, axis=1)


if __name__ == "__main__":
    # Module hyper-params (as in __init__); they only steer the CPU-side PH
    # map construction, which is synthesized deterministically here.
    topo_birth, topo_death, topo_noisy, topo_dim = True, True, False, 1

    B, C, H, W = 2, 4, 16, 16
    key = jax.random.PRNGKey(0)
    k1, k2, k3 = jax.random.split(key, 3)

    pred = jax.random.normal(k1, (B, C, H, W), dtype=jnp.float32)
    target = jax.random.normal(k2, (B, C, H, W), dtype=jnp.float32)
    # Exercise both "degenerate (constant) channel -> 0 loss" paths:
    pred = pred.at[0, 1].set(0.0)       # constant pred channel
    target = target.at[1, 2].set(0.5)   # constant target channel

    # Deterministic stand-in for the PH-derived critical-point maps:
    # weight = 1 at ~5% "critical" pixels (binary -> exact in int8, shrinks
    # that HBM stream 4x), ref = matched target intensity there.
    weight_map = (jax.random.uniform(k3, (B, C, H, W)) < 0.05).astype(jnp.int8)
    ref_map = weight_map.astype(jnp.float32) * target

    ref = jax.block_until_ready(
        topo_mse_reference(pred, target, weight_map, ref_map))

    # Default tiling (single spatial chunk at these shapes).
    out = jax.block_until_ready(topo_mse_2d(pred, target, weight_map, ref_map))
    assert out.shape == (B,)
    np.testing.assert_allclose(np.asarray(out), np.asarray(ref),
                               rtol=1e-5, atol=1e-5)

    # Also exercise the spatial "arbitrary" reduction axis (running
    # sum/max/min accumulators across 2 chunks of 128 lanes).
    out2 = jax.block_until_ready(
        topo_mse_2d(pred, target, weight_map, ref_map, hw_chunk=128))
    np.testing.assert_allclose(np.asarray(out2), np.asarray(ref),
                               rtol=1e-5, atol=1e-5)

    print("KERNEL_OK")
</pallas_src>

<mosaic_0001>
module attributes {stable_mosaic.version = 11 : i64} {
  func.func @_topo_mse_kernel(%arg0: i32, %arg1: i32, %arg2: memref<8x1xf32, #tpu.memory_space<vmem>>, %arg3: memref<8x256xf32, #tpu.memory_space<vmem>>, %arg4: memref<8x256xi8, #tpu.memory_space<vmem>>, %arg5: memref<8x256xf32, #tpu.memory_space<vmem>>, %arg6: memref<8x128xf32, #tpu.memory_space<vmem>>, %arg7: memref<8x1xf32, #tpu.memory_space<vmem>>, %arg8: memref<8x1xf32, #tpu.memory_space<vmem>>, %arg9: memref<8x1xf32, #tpu.memory_space<vmem>>) attributes {dimension_semantics = [#tpu.dimension_semantics<parallel>, #tpu.dimension_semantics<arbitrary>], iteration_bounds = array<i64: 1, 1>, scalar_prefetch = 0 : i64, scratch_operands = 3 : i64, tpu.core_type = #tpu.core_type<tc>, window_params = [{transform_indices = @transform_0, window_bounds = array<i64: 8, 1>}, {transform_indices = @transform_1, window_bounds = array<i64: 8, 256>}, {transform_indices = @transform_2, window_bounds = array<i64: 8, 256>}, {transform_indices = @transform_3, window_bounds = array<i64: 8, 256>}, {transform_indices = @transform_4, window_bounds = array<i64: 8, 128>}]} {
    %c0_i32 = arith.constant 0 : i32
    %0 = arith.cmpi eq, %arg1, %c0_i32 : i32
    %1 = arith.extui %0 : i1 to i32
    %c0_i32_0 = arith.constant 0 : i32
    %2 = arith.cmpi ne, %1, %c0_i32_0 : i32
    scf.if %2 {
      %cst_22 = arith.constant 0.000000e+00 : f32
      %28 = vector.broadcast %cst_22 : f32 to vector<8x1xf32>
      %c0_23 = arith.constant 0 : index
      %c0_24 = arith.constant 0 : index
      %29 = vector.load %arg7[%c0_23, %c0_24] : memref<8x1xf32, #tpu.memory_space<vmem>>, vector<8x1xf32>
      tpu.vector_store %arg7[%c0_23, %c0_24], %28 {strides = array<i32>} : memref<8x1xf32, #tpu.memory_space<vmem>>, vector<8x1xf32>,
      %cst_25 = arith.constant 0xFF800000 : f32
      %30 = vector.broadcast %cst_25 : f32 to vector<8x1xf32>
      %c0_26 = arith.constant 0 : index
      %c0_27 = arith.constant 0 : index
      %31 = vector.load %arg8[%c0_26, %c0_27] : memref<8x1xf32, #tpu.memory_space<vmem>>, vector<8x1xf32>
      tpu.vector_store %arg8[%c0_26, %c0_27], %30 {strides = array<i32>} : memref<8x1xf32, #tpu.memory_space<vmem>>, vector<8x1xf32>,
      %cst_28 = arith.constant 0x7F800000 : f32
      %32 = vector.broadcast %cst_28 : f32 to vector<8x1xf32>
      %c0_29 = arith.constant 0 : index
      %c0_30 = arith.constant 0 : index
      %33 = vector.load %arg9[%c0_29, %c0_30] : memref<8x1xf32, #tpu.memory_space<vmem>>, vector<8x1xf32>
      tpu.vector_store %arg9[%c0_29, %c0_30], %32 {strides = array<i32>} : memref<8x1xf32, #tpu.memory_space<vmem>>, vector<8x1xf32>,
    } else {
    }
    %c0 = arith.constant 0 : index
    %c0_1 = arith.constant 0 : index
    %3 = vector.load %arg3[%c0, %c0_1] : memref<8x256xf32, #tpu.memory_space<vmem>>, vector<8x256xf32>
    %c0_2 = arith.constant 0 : index
    %c0_3 = arith.constant 0 : index
    %4 = vector.load %arg4[%c0_2, %c0_3] : memref<8x256xi8, #tpu.memory_space<vmem>>, vector<8x256xi8>
    %5 = arith.sitofp %4 : vector<8x256xi8> to vector<8x256xf32>
    %c0_4 = arith.constant 0 : index
    %c0_5 = arith.constant 0 : index
    %6 = vector.load %arg5[%c0_4, %c0_5] : memref<8x256xf32, #tpu.memory_space<vmem>>, vector<8x256xf32>
    %7 = arith.mulf %3, %5 : vector<8x256xf32>
    %8 = arith.subf %7, %6 : vector<8x256xf32>
    %c0_6 = arith.constant 0 : index
    %c0_7 = arith.constant 0 : index
    %9 = vector.load %arg7[%c0_6, %c0_7] : memref<8x1xf32, #tpu.memory_space<vmem>>, vector<8x1xf32>
    %10 = arith.mulf %8, %8 : vector<8x256xf32>
    %cst = arith.constant dense<0.000000e+00> : vector<8xf32>
    %11 = vector.multi_reduction <add>, %10, %cst [1] : vector<8x256xf32> to vector<8xf32>
    %12 = vector.shape_cast %11 : vector<8xf32> to vector<8x1xf32>
    %13 = arith.addf %9, %12 : vector<8x1xf32>
    %c0_8 = arith.constant 0 : index
    %c0_9 = arith.constant 0 : index
    %14 = vector.load %arg7[%c0_8, %c0_9] : memref<8x1xf32, #tpu.memory_space<vmem>>, vector<8x1xf32>
    tpu.vector_store %arg7[%c0_8, %c0_9], %13 {strides = array<i32>} : memref<8x1xf32, #tpu.memory_space<vmem>>, vector<8x1xf32>,
    %c0_10 = arith.constant 0 : index
    %c0_11 = arith.constant 0 : index
    %15 = vector.load %arg8[%c0_10, %c0_11] : memref<8x1xf32, #tpu.memory_space<vmem>>, vector<8x1xf32>
    %cst_12 = arith.constant dense<0xFF800000> : vector<8xf32>
    %16 = vector.multi_reduction <maximumf>, %3, %cst_12 [1] : vector<8x256xf32> to vector<8xf32>
    %17 = vector.shape_cast %16 : vector<8xf32> to vector<8x1xf32>
    %18 = arith.maximumf %15, %17 : vector<8x1xf32>
    %c0_13 = arith.constant 0 : index
    %c0_14 = arith.constant 0 : index
    %19 = vector.load %arg8[%c0_13, %c0_14] : memref<8x1xf32, #tpu.memory_space<vmem>>, vector<8x1xf32>
    tpu.vector_store %arg8[%c0_13, %c0_14], %18 {strides = array<i32>} : memref<8x1xf32, #tpu.memory_space<vmem>>, vector<8x1xf32>,
    %c0_15 = arith.constant 0 : index
    %c0_16 = arith.constant 0 : index
    %20 = vector.load %arg9[%c0_15, %c0_16] : memref<8x1xf32, #tpu.memory_space<vmem>>, vector<8x1xf32>
    %cst_17 = arith.constant dense<0x7F800000> : vector<8xf32>
    %21 = vector.multi_reduction <minimumf>, %3, %cst_17 [1] : vector<8x256xf32> to vector<8xf32>
    %22 = vector.shape_cast %21 : vector<8xf32> to vector<8x1xf32>
    %23 = arith.minimumf %20, %22 : vector<8x1xf32>
    %c0_18 = arith.constant 0 : index
    %c0_19 = arith.constant 0 : index
    %24 = vector.load %arg9[%c0_18, %c0_19] : memref<8x1xf32, #tpu.memory_space<vmem>>, vector<8x1xf32>
    tpu.vector_store %arg9[%c0_18, %c0_19], %23 {strides = array<i32>} : memref<8x1xf32, #tpu.memory_space<vmem>>, vector<8x1xf32>,
    %c0_i32_20 = arith.constant 0 : i32
    %25 = arith.cmpi eq, %arg1, %c0_i32_20 : i32
    %26 = arith.extui %25 : i1 to i32
    %c0_i32_21 = arith.constant 0 : i32
    %27 = arith.cmpi ne, %26, %c0_i32_21 : i32
    scf.if %27 {
      %c0_22 = arith.constant 0 : index
      %c0_23 = arith.constant 0 : index
      %28 = vector.load %arg8[%c0_22, %c0_23] : memref<8x1xf32, #tpu.memory_space<vmem>>, vector<8x1xf32>
      %c0_24 = arith.constant 0 : index
      %c0_25 = arith.constant 0 : index
      %29 = vector.load %arg9[%c0_24, %c0_25] : memref<8x1xf32, #tpu.memory_space<vmem>>, vector<8x1xf32>
      %30 = arith.cmpf oeq, %28, %29 : vector<8x1xf32>
      %c0_26 = arith.constant 0 : index
      %c0_27 = arith.constant 0 : index
      %31 = vector.load %arg2[%c0_26, %c0_27] : memref<8x1xf32, #tpu.memory_space<vmem>>, vector<8x1xf32>
      %cst_28 = arith.constant 5.000000e-01 : f32
      %32 = vector.broadcast %cst_28 : f32 to vector<8x1xf32>
      %33 = arith.cmpf ogt, %31, %32 : vector<8x1xf32>
      %34 = arith.ori %30, %33 : vector<8x1xi1>
      %c0_29 = arith.constant 0 : index
      %c0_30 = arith.constant 0 : index
      %35 = vector.load %arg7[%c0_29, %c0_30] : memref<8x1xf32, #tpu.memory_space<vmem>>, vector<8x1xf32>
      %cst_31 = arith.constant 0.000000e+00 : f32
      %36 = vector.broadcast %cst_31 : f32 to vector<8x1xf32>
      %37 = arith.select %34, %36, %35 : vector<8x1xi1>, vector<8x1xf32>
      %38 = vector.shape_cast %37 : vector<8x1xf32> to vector<8x1xf32>
      %39 = vector.broadcast %38 : vector<8x1xf32> to vector<8x128xf32>
      %c0_32 = arith.constant 0 : index
      %c0_33 = arith.constant 0 : index
      %40 = vector.load %arg6[%c0_32, %c0_33] : memref<8x128xf32, #tpu.memory_space<vmem>>, vector<8x128xf32>
      tpu.vector_store %arg6[%c0_32, %c0_33], %39 {strides = array<i32>} : memref<8x128xf32, #tpu.memory_space<vmem>>, vector<8x128xf32>,
    } else {
    }
    return
  }
  func.func @transform_0(%arg0: i32, %arg1: i32) -> (i32, i32) {
    %c0_i32 = arith.constant 0 : i32
    %c0_i32_0 = arith.constant 0 : i32
    return %arg0, %c0_i32 : i32, i32
  }
  func.func @transform_1(%arg0: i32, %arg1: i32) -> (i32, i32) {
    %c0_i32 = arith.constant 0 : i32
    return %arg0, %arg1 : i32, i32
  }
  func.func @transform_2(%arg0: i32, %arg1: i32) -> (i32, i32) {
    %c0_i32 = arith.constant 0 : i32
    return %arg0, %arg1 : i32, i32
  }
  func.func @transform_3(%arg0: i32, %arg1: i32) -> (i32, i32) {
    %c0_i32 = arith.constant 0 : i32
    return %arg0, %arg1 : i32, i32
  }
  func.func @transform_4(%arg0: i32, %arg1: i32) -> (i32, i32) {
    %c0_i32 = arith.constant 0 : i32
    %c0_i32_0 = arith.constant 0 : i32
    return %arg0, %c0_i32 : i32, i32
  }
}

</mosaic_0001>

<bundles_post_ra>
// kernel: tpu_custom_call.1
= control target key start
LH: loop header
LB: loop body
LE: loop exit
PB: predicated region body
PF: predicated region fallthrough
CT: control target
= control target key end

     0   :  { %9 = vsyncpa [#allocation6], 0  ;;  %s245_s0 = inlined_call_operand.vmem [shape: f32[8,1], index: 0, kind: input, shape index: {}]   ;;  %s246_s1 = inlined_call_operand.hbm [shape: f32[8,256], index: 1, kind: input, shape index: {}]   ;;  %s247_s2 = inlined_call_operand.vmem [shape: s8[8,256], index: 2, kind: input, shape index: {}]   ;;  %s248_s3 = inlined_call_operand.hbm [shape: f32[8,256], index: 3, kind: input, shape index: {}]   ;;  %s249_s4 = inlined_call_operand.hbm [shape: f32[8,128], index: 4, kind: output, shape index: {}]  }
   0x1   :  { %10 = vsyncpa [#allocation9], 0 }
   0x2   :  { %11 = vsyncpa [#allocation7], 0  ;;  %s192_s15 = smov [#allocation5]   ;;  %s193_s17 = smov [#allocation8]  }
   0x3   :  { %s20_s16 = sshll.u32 %s192_s15, 4  ;;  %s32_s18 = sshll.u32 %s193_s17, 4  ;;  %s21_s16 = int_to_ptr.vmem [resolvable:$true] %s20_s16  ;;  %s33_s18 = int_to_ptr.vmem [resolvable:$true] %s32_s18 }
   0x4   :  { %s134_s19 = scalar_lea.vmem %s21_s16, 256  ;;  %p139_p1 = scmp.lt.s32.totalorder %s21_s16, %s21_s16 }
   0x5   :  { %p135_p0 = scmp.ne.s32.totalorder %s21_s16, %s134_s19  ;;  %p140_p2 = scmp.lt.s32.totalorder %s134_s19, %s134_s19 }
   0x7   :  { %p141_p3 = por %p140_p2, %p139_p1 }
   0x9   :  { %p142_p4 = pnand %p141_p3, %p135_p0 }
   0xb   :  { %145 = shalt.err (!%p142_p4)
}
   0xc   :  { %23 = dma.hbm_to_vmem [thread:$0]  %s246_s1, 256, %s21_s16, [#allocation6]  }
   0xd   :  { %s154_s22 = scalar_lea.vmem %s33_s18, 256  ;;  %p159_p6 = scmp.lt.s32.totalorder %s33_s18, %s33_s18 }
   0xe   :  { %p155_p5 = scmp.ne.s32.totalorder %s33_s18, %s154_s22  ;;  %p160_p7 = scmp.lt.s32.totalorder %s154_s22, %s154_s22 }
  0x10   :  { %p161_p8 = por %p160_p7, %p159_p6 }
  0x12   :  { %p162_p9 = pnand %p161_p8, %p155_p5 }
  0x14   :  { %165 = shalt.err (!%p162_p9)
}
  0x15   :  { %35 = dma.hbm_to_vmem [thread:$0]  %s248_s3, 256, %s33_s18, [#allocation9]  }
  0x16   :  { %186 = dma.done.wait [#allocation6], 256  }
  0x17   :  { %187 = vsyncadd [#allocation6], 4294967040 }
  0x18   :  { %188 = dma.done.wait [#allocation9], 256  }
  0x19   :  { %189 = vsyncadd [#allocation9], 4294967040  ;;  %vm46_vm0 = vcmask 7168   ;;  %v194_v0 = vmov -inf   ;;  %v50_v1 = vld [vmem:[#allocation5] sm:$0xff]  ;;  %v51_v2 = vld [vmem:[#allocation5 + $0x8] sm:$0xff] }
  0x1a   :  { %48 = vst.msk [vmem:[#allocation3] sm:$0xff] %vm46_vm0, %v194_v0  ;;  %v52_v3 = vld [vmem:[%s247_s2] sm:$0xf]  ;;  %v73_v4 = vmax.f32 %v50_v1, %v51_v2  ;;  %v79_v7 = vmin.f32 %v50_v1, %v51_v2  ;;  %v57_v10 = vld [vmem:[#allocation8] sm:$0xff]  ;;  %v58_v11 = vld [vmem:[#allocation8 + $0x8] sm:$0xff]  ;;  %v195_v18 = vmov inf  }
  0x1b   :  { %v53_v5 = vunpack.c.0.s8 %v52_v3  ;;  %v54_v6 = vunpack.c.1.s8 %v52_v3  ;;  %49 = vst.msk [vmem:[#allocation4] sm:$0xff] %vm46_vm0, %v195_v18  ;;  %v196_v20 = vmov 0.0   ;;  %v197_v21 = vmov 0   ;;  %v90_v33 = vld [vmem:[%s245_s0] sm:$0xff]  ;;  %s198_s26 = smov [#allocation10]  }
  0x1c   :  { %74 = vmax.xlane.f32.xlu0 %v73_v4  ;;  %47 = vst.msk [vmem:[#allocation2] sm:$0xff] %vm46_vm0, %v196_v20  ;;  %124 = vset.pattern.permute.xlu1 %v197_v21  ;;  %vm91_vm2 = vcmp.gt.f32.partialorder %v90_v33, 0.5  ;;  %s107_s27 = sshll.u32 %s198_s26, 4  ;;  %s108_s27 = int_to_ptr.vmem [resolvable:$true] %s107_s27 }
  0x1d   :  { %v55_v8 = vcvt.s32.f32 %v53_v5  ;;  %v56_v9 = vcvt.s32.f32 %v54_v6  ;;  %125 = vset.pattern.permute.xlu0 %v197_v21  ;;  %s166_s28 = scalar_lea.vmem %s108_s27, 128  ;;  %p171_p11 = scmp.lt.s32.totalorder %s108_s27, %s108_s27 }
  0x1e   :  { %p167_p10 = scmp.ne.s32.totalorder %s108_s27, %s166_s28  ;;  %p172_p12 = scmp.lt.s32.totalorder %s166_s28, %s166_s28 }
  0x1f   :  { %v59_v12 = vmul.f32 %v55_v8, %v50_v1  ;;  %v60_v13 = vmul.f32 %v56_v9, %v51_v2 }
  0x20   :  { %80 = vmin.xlane.f32.xlu0 %v79_v7  ;;  %p173_p13 = por %p172_p12, %p171_p11 }
  0x21   :  { %v61_v14 = vsub.f32 %v59_v12, %v57_v10  ;;  %v62_v15 = vsub.f32 %v60_v13, %v58_v11  ;;  %v72_v22 = vld [vmem:[#allocation3] sm:$0xff] }
  0x22   :  { %v78_v25 = vld [vmem:[#allocation4] sm:$0xff]  ;;  %p174_p0 = pnand %p173_p13, %p167_p10 }
  0x23   :  { %v64_v16 = vmul.f32 %v61_v14, %v61_v14  ;;  %v65_v17 = vmul.f32 %v62_v15, %v62_v15  ;;  %v63_v28 = vld [vmem:[#allocation2] sm:$0xff] }
  0x25   :  { %v66_v19 = vadd.f32 %v65_v17, %v64_v16 }
  0x27   :  { %67 = vadd.xlane.f32.xlu1 %v66_v19 }
  0xa5   :  { %v75_v23 = vpop.xlane.xlu0 %74 }
  0xa6   :  { %v76_v24 = vmax.f32 %v72_v22, %v75_v23 }
  0xa8   :  { %77 = vst.msk [vmem:[#allocation3] sm:$0xff] %vm46_vm0, %v76_v24 }
  0xa9   :  { %v81_v26 = vpop.xlane.xlu0 %80 }
  0xaa   :  { %v82_v27 = vmin.f32 %v78_v25, %v81_v26 }
  0xac   :  { %83 = vst.msk [vmem:[#allocation4] sm:$0xff] %vm46_vm0, %v82_v27 }
  0xaf   :  { %v87_v31 = vld [vmem:[#allocation3] sm:$0xff] }
  0xb0   :  { %v68_v29 = vpop.xlane.xlu1 %67 }
  0xb1   :  { %v69_v30 = vadd.f32 %v68_v29, %v63_v28 }
  0xb3   :  { %71 = vst.msk [vmem:[#allocation2] sm:$0xff] %vm46_vm0, %v69_v30  ;;  %v88_v32 = vld [vmem:[#allocation4] sm:$0xff] }
  0xb4   :  { %vm89_vm1 = vcmp.eq.f32.partialorder %v87_v31, %v88_v32 }
  0xb5   :  { %vm92_vm3 = vmor %vm89_vm1, %vm91_vm2 }
  0xba   :  { %v93_v34 = vld [vmem:[#allocation2] sm:$0xff] }
  0xbb   :  { %v94_v35 = vsel %vm92_vm3, 0.0, %v93_v34 }
  0xbc   :  { %97 = vperm.xlu1 %124, %v94_v35  }
 0x137   :  { %v98_v36 = vpop.permute.xlu1 %97 }
 0x138   :  { %100 = vst [vmem:[#allocation10] sm:$0xff] %v98_v36 }
 0x139   :  { %177 = shalt.err (!%p174_p0)
}
 0x13a   :  { %110 = dma.vmem_to_hbm [thread:$0]  %s108_s27, 128, %s249_s4, [#allocation7]  }
 0x13b   :  { %190 = dma.done.wait [#allocation7], 128  }
 0x13c   :  { %191 = vsyncadd [#allocation7], 4294967168 }
 0x13d   :  { %114 = vsyncpa [#allocation6], 1 }
 0x13e   :  { %115 = vsyncpa [#allocation9], 1 }
 0x13f   :  { %116 = vsyncpa [#allocation7], 1 }

</bundles_post_ra>
